<compile_context>
chip_gen: v7x
topology: tpu7x:2x2x1
jax: 0.10.0
libtpu: 0.0.40
codegen_flags: <defaults>
</compile_context>

<pallas_src>
import functools

import jax
import jax.numpy as jnp
from jax.experimental import pallas as pl
from jax.experimental.pallas import tpu as pltpu


def _attention_kernel(x_ref, wqkv_ref, wo_ref, bo_ref, o_ref, qkv_ref, hid_ref,
                      *, heads, dim_head):
    """Fused attention for one batch element; layout (C, N): sequence on lanes."""
    hidden = heads * dim_head

    x_bf = x_ref[...].astype(jnp.bfloat16)                          # (dim, n)
    # 1x1-conv QKV projection. Weight stored (dim, 3*hidden) (lane-dense), with
    # the q-scale already folded into its Q columns; contract the shared dim axis.
    qkv = jax.lax.dot_general(wqkv_ref[...], x_bf, (((0,), (0,)), ((), ())),
                              preferred_element_type=jnp.float32)   # (3*hidden, n)
    qkv_ref[...] = qkv.astype(jnp.bfloat16)

    def head_body(h, carry):
        off = pl.multiple_of(h * dim_head, dim_head)
        q = qkv_ref[pl.ds(off, dim_head), :]                        # (d, n) bf16, pre-scaled
        k = qkv_ref[pl.ds(hidden + off, dim_head), :]               # (d, n)
        v = qkv_ref[pl.ds(2 * hidden + off, dim_head), :]           # (d, n)

        # sim[i, j] = sum_d q[d, i] * k[d, j]; bf16 MXU, f32 accumulation.
        sim = jax.lax.dot_general(q, k, (((0,), (0,)), ((), ())),
                                  preferred_element_type=jnp.float32)   # (n, n)
        sim = sim - jnp.max(sim, axis=-1, keepdims=True)
        p = jnp.exp(sim)                                            # f32 stats
        l = jnp.sum(p, axis=-1, keepdims=True)                      # (n, 1) f32

        # Unnormalized PV matmul, then deferred normalization by 1/l.
        out_un = jax.lax.dot_general(v, p.astype(jnp.bfloat16),
                                     (((1,), (1,)), ((), ())),
                                     preferred_element_type=jnp.float32)  # (d, n)
        inv_l = jnp.transpose(pl.reciprocal(l, approx=True))        # (1, n): one small XLU transpose
        hid_ref[pl.ds(off, dim_head), :] = (out_un * inv_l).astype(jnp.bfloat16)
        return carry

    jax.lax.fori_loop(0, heads, head_body, 0)

    # Output 1x1 conv: (dim, hidden) @ (hidden, n) + bias, f32 accumulation.
    y = jnp.dot(wo_ref[...], hid_ref[...], preferred_element_type=jnp.float32)
    o_ref[...] = (y + bo_ref[...]).astype(o_ref.dtype)


@functools.partial(jax.jit, static_argnames=("heads", "dim_head"))
def attention_forward(x, w_qkv, w_out, b_out, *, heads=4, dim_head=32):
    """x: (B, dim, N); w_qkv: (3*hidden, dim); w_out: (dim, hidden); b_out: (dim,)."""
    b, dim, n = x.shape
    hidden = heads * dim_head
    assert w_qkv.shape == (3 * hidden, dim)
    assert w_out.shape == (dim, hidden)

    scale = dim_head ** -0.5
    # Fold the q scale into the Q rows of the conv weight (one-time, resident),
    # transpose so the weight's lane dim is 3*hidden (lane-dense), cast to bf16.
    wqkv_t = jnp.transpose(w_qkv.at[:hidden].multiply(scale)).astype(jnp.bfloat16)
    wo = w_out.astype(jnp.bfloat16)
    bo2 = b_out.reshape(dim, 1).astype(jnp.float32)

    kernel = functools.partial(_attention_kernel, heads=heads, dim_head=dim_head)

    return pl.pallas_call(
        kernel,
        out_shape=jax.ShapeDtypeStruct((b, dim, n), x.dtype),
        grid_spec=pltpu.PrefetchScalarGridSpec(
            num_scalar_prefetch=0,
            grid=(b,),
            in_specs=[
                pl.BlockSpec((None, dim, n), lambda i: (i, 0, 0)),       # x, one batch slab
                pl.BlockSpec((dim, 3 * hidden), lambda i: (0, 0)),       # W_qkv^T (resident)
                pl.BlockSpec((dim, hidden), lambda i: (0, 0)),           # W_out  (resident)
                pl.BlockSpec((dim, 1), lambda i: (0, 0)),                # bias   (resident)
            ],
            out_specs=pl.BlockSpec((None, dim, n), lambda i: (i, 0, 0)),
            scratch_shapes=[
                pltpu.VMEM((3 * hidden, n), jnp.bfloat16),               # qkv staging
                pltpu.VMEM((hidden, n), jnp.bfloat16),                   # per-head outputs
            ],
        ),
        compiler_params=pltpu.CompilerParams(
            dimension_semantics=("parallel",)),
    )(x, wqkv_t, wo, bo2)


def _reference(x, w_qkv, w_out, b_out, heads, dim_head):
    """Plain-JAX reference matching the PyTorch Attention.forward."""
    b, dim, n = x.shape
    hidden = heads * dim_head
    scale = dim_head ** -0.5
    qkv = jnp.einsum('oc,bcn->bon', w_qkv, x)                     # (b, 3*hidden, n)
    q, k, v = jnp.split(qkv, 3, axis=1)
    q = q.reshape(b, heads, dim_head, n) * scale
    k = k.reshape(b, heads, dim_head, n)
    v = v.reshape(b, heads, dim_head, n)
    sim = jnp.einsum('bhdi,bhdj->bhij', q, k)
    attn = jax.nn.softmax(sim, axis=-1)
    out = jnp.einsum('bhij,bhdj->bhid', attn, v)                  # (b, h, n, d)
    out = jnp.transpose(out, (0, 1, 3, 2)).reshape(b, hidden, n)  # b h n d -> b (h d) n
    return jnp.einsum('oc,bcn->bon', w_out, out) + b_out.reshape(1, dim, 1)


if __name__ == "__main__":
    key = jax.random.PRNGKey(0)
    kx, kq, kw, kb = jax.random.split(key, 4)

    B, DIM, N = 2, 32, 128            # small; N=128 keeps the lane axis dense
    HEADS, DIM_HEAD = 4, 32           # module defaults -> hidden = 128
    HIDDEN = HEADS * DIM_HEAD

    x = jax.random.normal(kx, (B, DIM, N), dtype=jnp.float32)

    # Conv1d-style init (kernel size 1, so weights are plain matrices).
    bq = 1.0 / (DIM ** 0.5)
    w_qkv = jax.random.uniform(kq, (3 * HIDDEN, DIM), jnp.float32, -bq, bq)
    bo = 1.0 / (HIDDEN ** 0.5)
    w_out = jax.random.uniform(kw, (DIM, HIDDEN), jnp.float32, -bo, bo)
    b_out = jax.random.uniform(kb, (DIM,), jnp.float32, -bo, bo)

    out = attention_forward(x, w_qkv, w_out, b_out, heads=HEADS, dim_head=DIM_HEAD)
    out = jax.block_until_ready(out)

    ref = _reference(x, w_qkv, w_out, b_out, HEADS, DIM_HEAD)
    assert out.shape == x.shape and out.dtype == x.dtype
    assert jnp.allclose(out, ref, atol=3e-2, rtol=3e-2), (
        "mismatch vs reference: max abs diff = "
        f"{float(jnp.max(jnp.abs(out - ref)))}")

    print("KERNEL_OK")
</pallas_src>

<mosaic_0001>
module attributes {stable_mosaic.version = 11 : i64} {
  func.func @_attention_kernel(%arg0: i32, %arg1: memref<1x32x128xf32, #tpu.memory_space<vmem>>, %arg2: memref<32x384xbf16, #tpu.memory_space<vmem>>, %arg3: memref<32x128xbf16, #tpu.memory_space<vmem>>, %arg4: memref<32x1xf32, #tpu.memory_space<vmem>>, %arg5: memref<1x32x128xf32, #tpu.memory_space<vmem>>, %arg6: memref<384x128xbf16, #tpu.memory_space<vmem>>, %arg7: memref<128x128xbf16, #tpu.memory_space<vmem>>) attributes {dimension_semantics = [#tpu.dimension_semantics<parallel>], iteration_bounds = array<i64: 2>, scalar_prefetch = 0 : i64, scratch_operands = 2 : i64, tpu.core_type = #tpu.core_type<tc>, window_params = [{transform_indices = @transform_0, window_bounds = array<i64: 1, 32, 128>}, {pipeline_mode = #tpu.pipeline_mode<synchronous>, transform_indices = @transform_1, window_bounds = array<i64: 32, 384>}, {pipeline_mode = #tpu.pipeline_mode<synchronous>, transform_indices = @transform_2, window_bounds = array<i64: 32, 128>}, {pipeline_mode = #tpu.pipeline_mode<synchronous>, transform_indices = @transform_3, window_bounds = array<i64: 32, 1>}, {transform_indices = @transform_4, window_bounds = array<i64: 1, 32, 128>}]} {
    %c0 = arith.constant 0 : index
    %c0_0 = arith.constant 0 : index
    %c0_1 = arith.constant 0 : index
    %0 = vector.load %arg1[%c0, %c0_0, %c0_1] : memref<1x32x128xf32, #tpu.memory_space<vmem>>, vector<1x32x128xf32>
    %1 = vector.shape_cast %0 : vector<1x32x128xf32> to vector<32x128xf32>
    %2 = arith.truncf %1 : vector<32x128xf32> to vector<32x128xbf16>
    %c0_2 = arith.constant 0 : index
    %c0_3 = arith.constant 0 : index
    %3 = vector.load %arg2[%c0_2, %c0_3] : memref<32x384xbf16, #tpu.memory_space<vmem>>, vector<32x384xbf16>
    %cst = arith.constant dense<0.000000e+00> : vector<384x128xf32>
    %4 = tpu.matmul %3, %2, %cst {dimension_numbers = #tpu.dot_dimension_numbers<[0], [0], [1], [1], [0, 1, 1, 1], [], []>} : vector<32x384xbf16>, vector<32x128xbf16>, vector<384x128xf32> -> vector<384x128xf32>
    %5 = arith.truncf %4 : vector<384x128xf32> to vector<384x128xbf16>
    %c0_4 = arith.constant 0 : index
    %c0_5 = arith.constant 0 : index
    %6 = vector.load %arg6[%c0_4, %c0_5] : memref<384x128xbf16, #tpu.memory_space<vmem>>, vector<384x128xbf16>
    tpu.vector_store %arg6[%c0_4, %c0_5], %5 {strides = array<i32>} : memref<384x128xbf16, #tpu.memory_space<vmem>>, vector<384x128xbf16>,
    %c0_i32 = arith.constant 0 : i32
    %c4_i32 = arith.constant 4 : i32
    %7 = arith.addi %c0_i32, %c4_i32 : i32
    %c1_i32 = arith.constant 1 : i32
    scf.for %arg8 = %c0_i32 to %7 step %c1_i32  : i32 {
      %c32_i32 = arith.constant 32 : i32
      %17 = arith.muli %arg8, %c32_i32 : i32
      %18 = tpu.assume_multiple %17, 32 : i32
      %19 = arith.index_cast %18 : i32 to index
      %c0_17 = arith.constant 0 : index
      %20 = vector.load %arg6[%19, %c0_17] : memref<384x128xbf16, #tpu.memory_space<vmem>>, vector<32x128xbf16>
      %c128_i32 = arith.constant 128 : i32
      %21 = arith.addi %c128_i32, %18 : i32
      %22 = arith.index_cast %21 : i32 to index
      %c0_18 = arith.constant 0 : index
      %23 = vector.load %arg6[%22, %c0_18] : memref<384x128xbf16, #tpu.memory_space<vmem>>, vector<32x128xbf16>
      %c256_i32 = arith.constant 256 : i32
      %24 = arith.addi %c256_i32, %18 : i32
      %25 = arith.index_cast %24 : i32 to index
      %c0_19 = arith.constant 0 : index
      %26 = vector.load %arg6[%25, %c0_19] : memref<384x128xbf16, #tpu.memory_space<vmem>>, vector<32x128xbf16>
      %cst_20 = arith.constant dense<0.000000e+00> : vector<128x128xf32>
      %27 = tpu.matmul %20, %23, %cst_20 {dimension_numbers = #tpu.dot_dimension_numbers<[0], [0], [1], [1], [0, 1, 1, 1], [], []>} : vector<32x128xbf16>, vector<32x128xbf16>, vector<128x128xf32> -> vector<128x128xf32>
      %cst_21 = arith.constant dense<0xFF800000> : vector<128xf32>
      %28 = vector.multi_reduction <maximumf>, %27, %cst_21 [1] : vector<128x128xf32> to vector<128xf32>
      %29 = vector.shape_cast %28 : vector<128xf32> to vector<128x1xf32>
      %30 = vector.broadcast %29 : vector<128x1xf32> to vector<128x128xf32>
      %31 = arith.subf %27, %30 : vector<128x128xf32>
      %32 = math.exp %31 : vector<128x128xf32>
      %cst_22 = arith.constant dense<0.000000e+00> : vector<128xf32>
      %33 = vector.multi_reduction <add>, %32, %cst_22 [1] : vector<128x128xf32> to vector<128xf32>
      %34 = vector.shape_cast %33 : vector<128xf32> to vector<128x1xf32>
      %35 = arith.truncf %32 : vector<128x128xf32> to vector<128x128xbf16>
      %cst_23 = arith.constant dense<0.000000e+00> : vector<32x128xf32>
      %36 = tpu.matmul %26, %35, %cst_23 {dimension_numbers = #tpu.dot_dimension_numbers<[1], [1], [0], [0], [0, 0, 1, 0], [], []>} : vector<32x128xbf16>, vector<128x128xbf16>, vector<32x128xf32> -> vector<32x128xf32>
      %37 = tpu.reciprocal %34 {approx = true} : vector<128x1xf32> -> vector<128x1xf32>
      %38 = tpu.transpose %37, [1, 0] : vector<128x1xf32> -> vector<1x128xf32>
      %39 = vector.broadcast %38 : vector<1x128xf32> to vector<32x128xf32>
      %40 = arith.mulf %36, %39 : vector<32x128xf32>
      %41 = arith.truncf %40 : vector<32x128xf32> to vector<32x128xbf16>
      %42 = arith.index_cast %18 : i32 to index
      %c0_24 = arith.constant 0 : index
      %43 = vector.load %arg7[%42, %c0_24] : memref<128x128xbf16, #tpu.memory_space<vmem>>, vector<32x128xbf16>
      tpu.vector_store %arg7[%42, %c0_24], %41 {strides = array<i32>} : memref<128x128xbf16, #tpu.memory_space<vmem>>, vector<32x128xbf16>,
    }
    %c4_i32_6 = arith.constant 4 : i32
    %c0_7 = arith.constant 0 : index
    %c0_8 = arith.constant 0 : index
    %8 = vector.load %arg3[%c0_7, %c0_8] : memref<32x128xbf16, #tpu.memory_space<vmem>>, vector<32x128xbf16>
    %c0_9 = arith.constant 0 : index
    %c0_10 = arith.constant 0 : index
    %9 = vector.load %arg7[%c0_9, %c0_10] : memref<128x128xbf16, #tpu.memory_space<vmem>>, vector<128x128xbf16>
    %cst_11 = arith.constant dense<0.000000e+00> : vector<32x128xf32>
    %10 = tpu.matmul %8, %9, %cst_11 {dimension_numbers = #tpu.dot_dimension_numbers<[1], [0], [0], [1], [0, 0, 1, 1], [], []>} : vector<32x128xbf16>, vector<128x128xbf16>, vector<32x128xf32> -> vector<32x128xf32>
    %c0_12 = arith.constant 0 : index
    %c0_13 = arith.constant 0 : index
    %11 = vector.load %arg4[%c0_12, %c0_13] : memref<32x1xf32, #tpu.memory_space<vmem>>, vector<32x1xf32>
    %12 = vector.broadcast %11 : vector<32x1xf32> to vector<32x128xf32>
    %13 = arith.addf %10, %12 : vector<32x128xf32>
    %c0_14 = arith.constant 0 : index
    %c0_15 = arith.constant 0 : index
    %c0_16 = arith.constant 0 : index
    %14 = vector.load %arg5[%c0_14, %c0_15, %c0_16] : memref<1x32x128xf32, #tpu.memory_space<vmem>>, vector<1x32x128xf32>
    %15 = vector.shape_cast %14 : vector<1x32x128xf32> to vector<32x128xf32>
    %16 = vector.shape_cast %13 : vector<32x128xf32> to vector<1x32x128xf32>
    tpu.vector_store %arg5[%c0_14, %c0_15, %c0_16], %16 {strides = array<i32>} : memref<1x32x128xf32, #tpu.memory_space<vmem>>, vector<1x32x128xf32>,
    return
  }
  func.func @transform_0(%arg0: i32) -> (i32, i32, i32) {
    %c0_i32 = arith.constant 0 : i32
    %c0_i32_0 = arith.constant 0 : i32
    %c0_i32_1 = arith.constant 0 : i32
    return %arg0, %c0_i32, %c0_i32_0 : i32, i32, i32
  }
  func.func @transform_1(%arg0: i32) -> (i32, i32) {
    %c0_i32 = arith.constant 0 : i32
    %c0_i32_0 = arith.constant 0 : i32
    %c0_i32_1 = arith.constant 0 : i32
    return %c0_i32, %c0_i32_0 : i32, i32
  }
  func.func @transform_2(%arg0: i32) -> (i32, i32) {
    %c0_i32 = arith.constant 0 : i32
    %c0_i32_0 = arith.constant 0 : i32
    %c0_i32_1 = arith.constant 0 : i32
    return %c0_i32, %c0_i32_0 : i32, i32
  }
  func.func @transform_3(%arg0: i32) -> (i32, i32) {
    %c0_i32 = arith.constant 0 : i32
    %c0_i32_0 = arith.constant 0 : i32
    %c0_i32_1 = arith.constant 0 : i32
    return %c0_i32, %c0_i32_0 : i32, i32
  }
  func.func @transform_4(%arg0: i32) -> (i32, i32, i32) {
    %c0_i32 = arith.constant 0 : i32
    %c0_i32_0 = arith.constant 0 : i32
    %c0_i32_1 = arith.constant 0 : i32
    return %arg0, %c0_i32, %c0_i32_0 : i32, i32, i32
  }
}

</mosaic_0001>

<bundles_post_ra>
// kernel: attention_forward.1
= control target key start
LH: loop header
LB: loop body
LE: loop exit
PB: predicated region body
PF: predicated region fallthrough
CT: control target
= control target key end

     0   :  { %9 = vsyncpa [#allocation5], 0  ;;  %s1928_s0 = inlined_call_operand.vmem [shape: f32[2,32,128], index: 0, kind: input, shape index: {}]   ;;  %s1929_s1 = inlined_call_operand.vmem [shape: bf16[32,384], index: 1, kind: input, shape index: {}]   ;;  %s1930_s2 = inlined_call_operand.vmem [shape: bf16[32,128], index: 2, kind: input, shape index: {}]   ;;  %s1931_s3 = inlined_call_operand.vmem [shape: f32[32,1], index: 3, kind: input, shape index: {}]   ;;  %s1932_s4 = inlined_call_operand.hbm [shape: f32[2,32,128], index: 4, kind: output, shape index: {}]  }
   0x1   :  { %11 = vsyncpa [#allocation5 + $0x1], 0  ;;  %s1681_s15 = smov 0   ;;  %s1683_s16 = smov 0  }
   0x2   :  { %s1685_s17 = smov 0   ;;  %s1687_s18 = smov 0  }
   0x3 LB: > { %s1702_s19 = sadd.s32 4294967295, %s1646_s18   ;;  %s1222_s20 = sadd.s32 4294967294, %s1646_s18   ;;  %s1646_s18 = sphi %s1687_s18, %s1938_s18   ;;  %s1642_s17 = sphi %s1685_s17, %s1937_s17   ;;  %s1638_s16 = sphi %s1683_s16, %s1936_s16   ;;  %s1634_s15 = sphi %s1681_s15, %s1935_s15  }
   0x4   : > { %s1706_s21 = sadd.s32 1, %s1646_s18   ;;  %s113_s22 = sadd.s32 1, %s1642_s17 }
   0x5   : > { %s110_s23 = ssub.s32 %s1646_s18, %s1706_s21  ;;  %p123_p0 = scmp.ne.s32.totalorder %s1642_s17, %s1638_s16 }
   0x6   : > { %p111_p1 = scmp.eq.s32.totalorder %s110_s23, 0  ;;  %p124_p2 = scmp.eq.s32.totalorder %s1702_s19, 1 }
   0x7   : > { %p129_p3 = scmp.ne.s32.totalorder %s1638_s16, %s1634_s15  ;;  %p130_p4 = scmp.eq.s32.totalorder %s1222_s20, 1 }
   0x8   : > { %s1717_s24 = scalar_select %p111_p1, %s1642_s17, %s113_s22  }
   0x9   : > { %p1719_p5 = por %p124_p2, %p123_p0  ;;  %p1723_p6 = por %p130_p4, %p129_p3 }
   0xa   : > { %p1225_p7 = scmp.ge.s32.totalorder %s1646_s18, 1  ;;  %p165_p8 = scmp.lt.s32.totalorder %s1646_s18, 3 }
   0xc   : > { %p166_p9 = pnand %p1225_p7, %p165_p8 }
   0xd   : > { %v1504_v0 = vld [vmem:[%s1929_s1 + $0x4] ss:$12 sps:$4 sm:$0xff] (!%p166_p9)   ;;  %s188_s29 = sand.u32 (!%p166_p9), 1, %s1638_s16   ;;  %p191_p10 = scmp.lt.s32.totalorder (!%p166_p9), %s1702_s19, 1  ;;  %v1506_v1 = vld [vmem:[%s1929_s1] ss:$12 sps:$4 sm:$0xff] (!%p166_p9)  }
   0xe   : > { %169 = sbr.rel (%p166_p9) target bundleno = 1447 (0x5a7), region = 36  ;;  %s1739_s6 = sshll.u32 (!%p166_p9), %s188_s29, 5  ;;  %259 = vxpose.xlu0.c.b16.start [1/2] (short) (!%p166_p9), %v1504_v0, 128  ;;  %v1507_v2 = vld [vmem:[%s1929_s1 + $0x1c] ss:$12 sps:$4 sm:$0xff] (!%p166_p9)   ;;  %243 = vxpose.xlu1.c.b16.start [1/2] (short) (!%p166_p9), %v1506_v1, 128  ;;  %v1509_v3 = vld [vmem:[%s1929_s1 + $0x18] ss:$12 sps:$4 sm:$0xff] (!%p166_p9)  }
   0xf   : > { %v1510_v10 = vld [vmem:[%s1929_s1 + $0x8] ss:$12 sps:$4 sm:$0xff] (!%p166_p9)   ;;  %v1511_v11 = vld [vmem:[%s1929_s1 + $0x20] ss:$12 sps:$4 sm:$0xff] (!%p166_p9)   ;;  %vm291_vm0 = vcmask (!%p166_p9), 261120   ;;  %s1782_s30 = scalar_lea.vmem (!%p166_p9), [#allocation4], %s1739_s6 }
  0x10   : > { %s1784_s5 = smov (!%p166_p9), 0  }
  0x12   : > { %260 = vxpose.xlu0.c.b16.end [2/2] (short) (!%p166_p9), %v1507_v2, 128  ;;  %244 = vxpose.xlu1.c.b16.end [2/2] (short) (!%p166_p9), %v1509_v3, 128 }
  0x15   : > { %s192_s11 = scalar_select %p191_p10, %s1702_s19, 1 }
  0x17   : > { %s1279_s12 = sshll.u32 %s192_s11, 5 }
  0x18   : > { %s195_s20 = scalar_lea.vmem %s1928_s0, %s1279_s12 }
  0x19   : > { %v197_v4 = vld [vmem:[%s195_s20] sm:$0xff]  ;;  %v198_v5 = vld [vmem:[%s195_s20 + $0x8] sm:$0xff]  ;;  %v199_v6 = vld [vmem:[%s195_s20 + $0x10] sm:$0xff] }
  0x1a   : > { %v201_v7 = vpack.c.bf16 %v198_v5, %v197_v4  ;;  %v200_v8 = vld [vmem:[%s195_s20 + $0x18] sm:$0xff] }
  0x1b   : > { %v202_v9 = vpack.c.bf16 %v200_v8, %v199_v6 }
  0x1c   : > { %1337 = vmatprep.subr.bf16.mxu0 %v201_v7  ;;  %1449 = vmatprep.subr.bf16.mxu1 %v201_v7 }
  0x1d   : > { %1338 = vmatpush3.bf16.msra.mxu0 %v201_v7  ;;  %1451 = vmatpush3.bf16.msra.mxu1 %v201_v7 }
  0x1e   : > { %1339 = vmatprep.subr.bf16.mxu0 %v202_v9  ;;  %1450 = vmatprep.subr.bf16.mxu1 %v202_v9 }
  0x21   : > { %1340 = vmatpush3.bf16.msra.mxu0 %v202_v9  ;;  %1452 = vmatpush3.bf16.msra.mxu1 %v202_v9 }
  0x2b   : > { %275 = vxpose.xlu0.c.b16.start [1/2] (short) %v1510_v10, 128 }
  0x2f   : > { %276 = vxpose.xlu0.c.b16.end [2/2] (short) %v1511_v11, 128 }
  0x74   : > { %v267_v12 = vpop.trf.xlu0  ;;  %v251_v13 = vpop.trf.xlu1 }
  0x75   : > { %1341 = vmatprep.mubr.msk.bf16.mxu0 %vm291_vm0, %v251_v13 }
  0x78   : > { %v268_v14 = vpop.trf.xlu0  ;;  %v252_v15 = vpop.trf.xlu1 }
  0x79   : > { %1342 = vmatmul.mubr.msk.bf16.vlgmr.msra.gmra.mrb[0].mxu0 %vm291_vm0, %v252_v15 }
  0x7c   : > { %v269_v16 = vpop.trf.xlu0  ;;  %v253_v17 = vpop.trf.xlu1 }
  0x7d   : > { %1345 = vmatprep.mubr.msk.bf16.mxu0 %vm291_vm0, %v253_v17 }
  0x80   : > { %v270_v18 = vpop.trf.xlu0  ;;  %v254_v19 = vpop.trf.xlu1 }
  0x81   : > { %1346 = vmatmul.mubr.msk.bf16.gmra.mrb[4].mxu0 %vm291_vm0, %v254_v19 }
  0x84   : > { %v271_v20 = vpop.trf.xlu0  ;;  %v255_v21 = vpop.trf.xlu1 }
  0x85   : > { %1365 = vmatprep.mubr.msk.bf16.mxu1 %vm291_vm0, %v271_v20  ;;  %1349 = vmatprep.mubr.msk.bf16.mxu0 %vm291_vm0, %v255_v21 }
  0x88   : > { %v272_v22 = vpop.trf.xlu0  ;;  %v256_v23 = vpop.trf.xlu1 }
  0x89   : > { %1366 = vmatmul.mubr.msk.bf16.vlgmr.msra.gmra.mrb[0].mxu1 %vm291_vm0, %v272_v22  ;;  %1350 = vmatmul.mubr.msk.bf16.gmra.mrb[8].mxu0 %vm291_vm0, %v256_v23 }
  0x8c   : > { %v273_v24 = vpop.trf.xlu0  ;;  %v257_v25 = vpop.trf.xlu1 }
  0x8d   : > { %1369 = vmatprep.mubr.msk.bf16.mxu1 %vm291_vm0, %v273_v24  ;;  %1353 = vmatprep.mubr.msk.bf16.mxu0 %vm291_vm0, %v257_v25 }
  0x90   : > { %v274_v26 = vpop.trf.xlu0  ;;  %v258_v27 = vpop.trf.xlu1 }
  0x91   : > { %1370 = vmatmul.mubr.msk.bf16.gmra.mrb[4].mxu1 %vm291_vm0, %v274_v26  ;;  %1354 = vmatmul.mubr.msk.bf16.gmra.mrb[12].mxu0 %vm291_vm0, %v258_v27 }
  0x92   : > { %1357 = vmatprep.mubr.msk.bf16.mxu0 %vm291_vm0, %v267_v12 }
  0x94   : > { %v283_v28 = vpop.trf.xlu0 }
  0x95   : > { %1373 = vmatprep.mubr.msk.bf16.mxu1 %vm291_vm0, %v283_v28 }
  0x98   : > { %v284_v29 = vpop.trf.xlu0 }
  0x99   : > { %1374 = vmatmul.mubr.msk.bf16.gmra.mrb[8].mxu1 %vm291_vm0, %v284_v29  ;;  %1358 = vmatmul.mubr.msk.bf16.gmra.mrb[16].mxu0 %vm291_vm0, %v268_v14 }
  0x9a   : > { %1361 = vmatprep.mubr.msk.bf16.mxu0 %vm291_vm0, %v269_v16 }
  0x9c   : > { %v285_v30 = vpop.trf.xlu0 }
  0x9d   : > { %1377 = vmatprep.mubr.msk.bf16.mxu1 %vm291_vm0, %v285_v30 }
  0xa0   : > { %v286_v31 = vpop.trf.xlu0 }
  0xa1   : > { %1378 = vmatmul.mubr.msk.bf16.gmra.mrb[12].mxu1 %vm291_vm0, %v286_v31  ;;  %1362 = vmatmul.mubr.msk.bf16.gmra.mrb[20].mxu0 %vm291_vm0, %v270_v18 }
  0xa4   : > { %v287_v32 = vpop.trf.xlu0 }
  0xa5   : > { %1381 = vmatprep.mubr.msk.bf16.mxu1 %vm291_vm0, %v287_v32 }
  0xa8   : > { %v288_v33 = vpop.trf.xlu0 }
  0xa9   : > { %1382 = vmatmul.mubr.msk.bf16.gmra.mrb[16].mxu1 %vm291_vm0, %v288_v33 }
  0xac   : > { %v289_v34 = vpop.trf.xlu0 }
  0xad   : > { %1385 = vmatprep.mubr.msk.bf16.mxu1 %vm291_vm0, %v289_v34 }
  0xb0   : > { %v290_v35 = vpop.trf.xlu0 }
  0xb1   : > { %1386 = vmatmul.mubr.msk.bf16.gmra.mrb[20].mxu1 %vm291_vm0, %v290_v35 }
 0x14c   : > { %v1343_v36 = vpop.f32.mrb[0].mxu0 }
 0x14d   : > { %v398_v37 = vpop.f32.mrb[1].mxu0 }
 0x14e   : > { %v1344_v38 = vpop.f32.mrb[2].mxu0 }
 0x14f   : > { %v590_v39 = vpack.c.bf16 %v1344_v38, %v1343_v36  ;;  %v401_v40 = vpop.f32.mrb[3].mxu0 }
 0x150   : > { %v589_v41 = vpack.c.bf16 %v401_v40, %v398_v37 }
 0x151   : > { %614 = vst [vmem:[#allocation2 + $0x8] sm:$0xff] %v590_v39 }
 0x152   : > { %613 = vst [vmem:[#allocation2] sm:$0xff] %v589_v41 }
 0x154   : > { %v1347_v42 = vpop.f32.mrb[4].mxu0 }
 0x155   : > { %v414_v43 = vpop.f32.mrb[5].mxu0 }
 0x156   : > { %v1348_v44 = vpop.f32.mrb[6].mxu0 }
 0x157   : > { %v592_v45 = vpack.c.bf16 %v1348_v44, %v1347_v42  ;;  %v417_v46 = vpop.f32.mrb[7].mxu0 }
 0x158   : > { %v591_v47 = vpack.c.bf16 %v417_v46, %v414_v43 }
 0x159   : > { %616 = vst [vmem:[#allocation2 + $0x18] sm:$0xff] %v592_v45 }
 0x15a   : > { %615 = vst [vmem:[#allocation2 + $0x10] sm:$0xff] %v591_v47 }
 0x15c   : > { %v1367_v48 = vpop.f32.mrb[0].mxu1  ;;  %v1351_v50 = vpop.f32.mrb[8].mxu0 }
 0x15d   : > { %v494_v49 = vpop.f32.mrb[1].mxu1  ;;  %v430_v52 = vpop.f32.mrb[9].mxu0 }
 0x15e   : > { %v1368_v51 = vpop.f32.mrb[2].mxu1  ;;  %v1352_v55 = vpop.f32.mrb[10].mxu0 }
 0x15f   : > { %v602_v53 = vpack.c.bf16 %v1368_v51, %v1367_v48  ;;  %v497_v54 = vpop.f32.mrb[3].mxu1  ;;  %v594_v57 = vpack.c.bf16 %v1352_v55, %v1351_v50  ;;  %v433_v58 = vpop.f32.mrb[11].mxu0 }
 0x160   : > { %v601_v56 = vpack.c.bf16 %v497_v54, %v494_v49  ;;  %v593_v59 = vpack.c.bf16 %v433_v58, %v430_v52 }
 0x161   : > { %626 = vst [vmem:[#allocation2 + $0x68] sm:$0xff] %v602_v53  ;;  %618 = vst [vmem:[#allocation2 + $0x28] sm:$0xff] %v594_v57 }
 0x162   : > { %625 = vst [vmem:[#allocation2 + $0x60] sm:$0xff] %v601_v56  ;;  %617 = vst [vmem:[#allocation2 + $0x20] sm:$0xff] %v593_v59 }
 0x164   : > { %v1371_v60 = vpop.f32.mrb[4].mxu1  ;;  %v1355_v62 = vpop.f32.mrb[12].mxu0 }
 0x165   : > { %v510_v61 = vpop.f32.mrb[5].mxu1  ;;  %v446_v0 = vpop.f32.mrb[13].mxu0 }
 0x166   : > { %v1372_v63 = vpop.f32.mrb[6].mxu1  ;;  %v1356_v3 = vpop.f32.mrb[14].mxu0 }
 0x167   : > { %v604_v1 = vpack.c.bf16 %v1372_v63, %v1371_v60  ;;  %v513_v2 = vpop.f32.mrb[7].mxu1  ;;  %v596_v5 = vpack.c.bf16 %v1356_v3, %v1355_v62  ;;  %v449_v6 = vpop.f32.mrb[15].mxu0 }
 0x168   : > { %v603_v4 = vpack.c.bf16 %v513_v2, %v510_v61  ;;  %v595_v7 = vpack.c.bf16 %v449_v6, %v446_v0 }
 0x169   : > { %628 = vst [vmem:[#allocation2 + $0x78] sm:$0xff] %v604_v1  ;;  %620 = vst [vmem:[#allocation2 + $0x38] sm:$0xff] %v596_v5 }
 0x16a   : > { %627 = vst [vmem:[#allocation2 + $0x70] sm:$0xff] %v603_v4  ;;  %619 = vst [vmem:[#allocation2 + $0x30] sm:$0xff] %v595_v7 }
 0x16c   : > { %v1375_v8 = vpop.f32.mrb[8].mxu1  ;;  %v1359_v9 = vpop.f32.mrb[16].mxu0 }
 0x16d   : > { %v526_v10 = vpop.f32.mrb[9].mxu1  ;;  %v462_v11 = vpop.f32.mrb[17].mxu0 }
 0x16e   : > { %v1376_v12 = vpop.f32.mrb[10].mxu1  ;;  %v1360_v13 = vpop.f32.mrb[18].mxu0 }
 0x16f   : > { %v606_v14 = vpack.c.bf16 %v1376_v12, %v1375_v8  ;;  %v529_v15 = vpop.f32.mrb[11].mxu1  ;;  %v598_v16 = vpack.c.bf16 %v1360_v13, %v1359_v9  ;;  %v465_v17 = vpop.f32.mrb[19].mxu0 }
 0x170   : > { %v605_v18 = vpack.c.bf16 %v529_v15, %v526_v10  ;;  %v597_v19 = vpack.c.bf16 %v465_v17, %v462_v11 }
 0x171   : > { %630 = vst [vmem:[#allocation2 + $0x88] sm:$0xff] %v606_v14  ;;  %622 = vst [vmem:[#allocation2 + $0x48] sm:$0xff] %v598_v16 }
 0x172   : > { %629 = vst [vmem:[#allocation2 + $0x80] sm:$0xff] %v605_v18  ;;  %621 = vst [vmem:[#allocation2 + $0x40] sm:$0xff] %v597_v19 }
 0x174   : > { %v1379_v20 = vpop.f32.mrb[12].mxu1  ;;  %v1363_v21 = vpop.f32.mrb[20].mxu0 }
 0x175   : > { %v542_v22 = vpop.f32.mrb[13].mxu1  ;;  %v478_v23 = vpop.f32.mrb[21].mxu0 }
 0x176   : > { %v1380_v24 = vpop.f32.mrb[14].mxu1  ;;  %v1364_v25 = vpop.f32.mrb[22].mxu0 }
 0x177   : > { %v608_v26 = vpack.c.bf16 %v1380_v24, %v1379_v20  ;;  %v545_v27 = vpop.f32.mrb[15].mxu1  ;;  %v600_v28 = vpack.c.bf16 %v1364_v25, %v1363_v21  ;;  %v481_v29 = vpop.f32.mrb[23].mxu0 }
 0x178   : > { %v607_v30 = vpack.c.bf16 %v545_v27, %v542_v22  ;;  %v599_v31 = vpack.c.bf16 %v481_v29, %v478_v23 }
 0x179   : > { %632 = vst [vmem:[#allocation2 + $0x98] sm:$0xff] %v608_v26  ;;  %624 = vst [vmem:[#allocation2 + $0x58] sm:$0xff] %v600_v28 }
 0x17a   : > { %631 = vst [vmem:[#allocation2 + $0x90] sm:$0xff] %v607_v30  ;;  %623 = vst [vmem:[#allocation2 + $0x50] sm:$0xff] %v599_v31 }
 0x17c   : > { %v1383_v32 = vpop.f32.mrb[16].mxu1 }
 0x17d   : > { %v558_v33 = vpop.f32.mrb[17].mxu1 }
 0x17e   : > { %v1384_v34 = vpop.f32.mrb[18].mxu1 }
 0x17f   : > { %v610_v35 = vpack.c.bf16 %v1384_v34, %v1383_v32  ;;  %v561_v36 = vpop.f32.mrb[19].mxu1 }
 0x180   : > { %v609_v37 = vpack.c.bf16 %v561_v36, %v558_v33 }
 0x181   : > { %634 = vst [vmem:[#allocation2 + $0xa8] sm:$0xff] %v610_v35 }
 0x182   : > { %633 = vst [vmem:[#allocation2 + $0xa0] sm:$0xff] %v609_v37 }
 0x184   : > { %v1387_v38 = vpop.f32.mrb[20].mxu1 }
 0x185   : > { %v574_v39 = vpop.f32.mrb[21].mxu1 }
 0x186   : > { %v1388_v40 = vpop.f32.mrb[22].mxu1 }
 0x187   : > { %v612_v41 = vpack.c.bf16 %v1388_v40, %v1387_v38  ;;  %v577_v42 = vpop.f32.mrb[23].mxu1 }
 0x188   : > { %v611_v43 = vpack.c.bf16 %v577_v42, %v574_v39 }
 0x189   : > { %636 = vst [vmem:[#allocation2 + $0xb8] sm:$0xff] %v612_v41 }
 0x18a   : > { %635 = vst [vmem:[#allocation2 + $0xb0] sm:$0xff] %v611_v43 }
 0x18b LB: >> { %s1790_s7 = sshll.u32 %s1650_s5, 5  ;;  %s642_s5 = sadd.s32 1, %s1650_s5   ;;  %s1650_s5 = sphi %s1784_s5, %s642_s5  }
 0x18c   : >> { %s644_s8 = sshra.s32 %s1790_s7, 4  ;;  %s650_s9 = sadd.s32 128, %s1790_s7 }
 0x18d   : >> { %s1794_s10 = sshll.u32 %s644_s8, 3  ;;  %s651_s11 = sshra.s32 %s650_s9, 4 }
 0x18e   : >> { %s647_s6 = scalar_lea.vmem [#allocation2], %s1794_s10  ;;  %s1261_s12 = sshll.u32 %s651_s11, 3 }
 0x18f   : >> { %s654_s13 = scalar_lea.vmem [#allocation2], %s1261_s12  ;;  %s657_s14 = sadd.s32 256, %s1790_s7 }
 0x190   : >> { %s658_s20 = sshra.s32 %s657_s14, 4  ;;  %s1029_s27 = scalar_lea.vmem [#allocation3], %s1794_s10 }
 0x191   : >> { %v648_v44 = vld [vmem:[%s647_s6] sm:$0xff]  ;;  %v649_v45 = vld [vmem:[%s647_s6 + $0x8] sm:$0xff]  ;;  %s1262_s22 = sshll.u32 %s658_s20, 3  ;;  %p639_p11 = scmp.ge.s32.totalorder %s642_s5, 4  }
 0x192   : >> { %664 = vxpose.xlu0.c.b16.start [1/2] (short) %v648_v44, 128  ;;  %v655_v46 = vld [vmem:[%s654_s13] sm:$0xff]  ;;  %v656_v47 = vld [vmem:[%s654_s13 + $0x8] sm:$0xff]  ;;  %s1836_s23 = scalar_lea.vmem [#allocation2], %s1262_s22  ;;  %s1280_s22 = sshll.u32 (%p639_p11), %s1702_s19, 9 }
 0x193   : >> { %1389 = vmatprep.subr.bf16.mxu0 %v655_v46  ;;  %v662_v8 = vld [vmem:[%s1836_s23] sm:$0xff]  ;;  %s1878_s7 = scalar_lea.hbm (%p639_p11), %s1932_s4, %s1280_s22  ;;  %s1887_s19 = scalar_lea.sflag (%p639_p11), [#allocation5], %s188_s29 }
 0x194   : >> { %1390 = vmatpush3.bf16.msra.mxu0 %v655_v46  ;;  %1425 = vmatprep.mubr.bf16.mxu1 %v662_v8  ;;  %s1653_s9 = smov (%p639_p11), [#allocation4]  }
 0x195   : >> { %1391 = vmatprep.subr.bf16.mxu0 %v656_v47  ;;  %s1584_s5 = sshll.u32 (%p639_p11), %s1653_s9, 4  ;;  %s1585_s5 = int_to_ptr.vmem [resolvable:$false] %s1584_s5 }
 0x196   : >> { %665 = vxpose.xlu0.c.b16.end [2/2] (short) %v649_v45, 128  ;;  %s1586_s10 = scalar_lea.vmem (%p639_p11), %s1585_s5, 1024 }
 0x198   : >> { %1392 = vmatpush3.bf16.msra.mxu0 %v656_v47 }
 0x1f8   : >> { %v672_v48 = vpop.trf.xlu0 }
 0x1f9   : >> { %1393 = vmatprep.mubr.msk.bf16.mxu0 %vm291_vm0, %v672_v48 }
 0x1fc   : >> { %v673_v49 = vpop.trf.xlu0 }
 0x1fd   : >> { %1394 = vmatmul.mubr.msk.bf16.vlgmr.msra.gmra.mrb[0].mxu0 %vm291_vm0, %v673_v49 }
 0x200   : >> { %v674_v50 = vpop.trf.xlu0 }
 0x201   : >> { %1397 = vmatprep.mubr.msk.bf16.mxu0 %vm291_vm0, %v674_v50 }
 0x204   : >> { %v675_v51 = vpop.trf.xlu0 }
 0x205   : >> { %1398 = vmatmul.mubr.msk.bf16.gmra.mrb[4].mxu0 %vm291_vm0, %v675_v51 }
 0x208   : >> { %v676_v52 = vpop.trf.xlu0 }
 0x209   : >> { %1401 = vmatprep.mubr.msk.bf16.mxu0 %vm291_vm0, %v676_v52 }
 0x20c   : >> { %v677_v53 = vpop.trf.xlu0 }
 0x20d   : >> { %1402 = vmatmul.mubr.msk.bf16.gmra.mrb[8].mxu0 %vm291_vm0, %v677_v53 }
 0x210   : >> { %v678_v54 = vpop.trf.xlu0 }
 0x211   : >> { %1405 = vmatprep.mubr.msk.bf16.mxu0 %vm291_vm0, %v678_v54 }
 0x214   : >> { %v679_v55 = vpop.trf.xlu0 }
 0x215   : >> { %1406 = vmatmul.mubr.msk.bf16.gmra.mrb[12].mxu0 %vm291_vm0, %v679_v55 }
 0x2d0   : >> { %v1395_v56 = vpop.f32.mrb[0].mxu0 }
 0x2d1   : >> { %805 = vmax.xlane.f32.xlu0 %v1395_v56  ;;  %v738_v57 = vpop.f32.mrb[1].mxu0 }
 0x2d2   : >> { %801 = vmax.xlane.f32.xlu1 %v738_v57  ;;  %v1396_v58 = vpop.f32.mrb[2].mxu0 }
 0x2d3   : >> { %v741_v59 = vpop.f32.mrb[3].mxu0 }
 0x2d6   : >> { %803 = vmax.xlane.f32.xlu1 %v741_v59 }
 0x2d8   : >> { %v1805_v60 = vpop.f32.mrb[4].mxu0 }
 0x2d9   : >> { %v754_v61 = vpop.f32.mrb[5].mxu0 }
 0x2da   : >> { %807 = vmax.xlane.f32.xlu1 %v1396_v58  ;;  %v1807_v62 = vpop.f32.mrb[6].mxu0 }
 0x2db   : >> { %v757_v63 = vpop.f32.mrb[7].mxu0 }
 0x2de   : >> { %809 = vmax.xlane.f32.xlu1 %v754_v61 }
 0x2e0   : >> { %v1809_v0 = vpop.f32.mrb[8].mxu0 }
 0x2e1   : >> { %v1811_v1 = vpop.f32.mrb[9].mxu0 }
 0x2e2   : >> { %811 = vmax.xlane.f32.xlu1 %v757_v63  ;;  %v1813_v2 = vpop.f32.mrb[10].mxu0 }
 0x2e3   : >> { %v1815_v3 = vpop.f32.mrb[11].mxu0 }
 0x2e6   : >> { %813 = vmax.xlane.f32.xlu1 %v1805_v60 }
 0x2e8   : >> { %v1818_v4 = vpop.f32.mrb[12].mxu0 }
 0x2e9   : >> { %v1820_v5 = vpop.f32.mrb[13].mxu0 }
 0x2ea   : >> { %815 = vmax.xlane.f32.xlu1 %v1807_v62  ;;  %v1823_v6 = vpop.f32.mrb[14].mxu0 }
 0x2eb   : >> { %v1825_v7 = vpop.f32.mrb[15].mxu0 }
 0x2ec   : >> { %827 = vmax.xlane.f32.xlu0 %v1825_v7 }
 0x2ee   : >> { %817 = vmax.xlane.f32.xlu1 %v1811_v1 }
 0x2f0   : >> { %831 = vmax.xlane.f32.xlu0 %v1823_v6 }
 0x2f2   : >> { %819 = vmax.xlane.f32.xlu1 %v1815_v3 }
 0x2f6   : >> { %821 = vmax.xlane.f32.xlu1 %v1809_v0 }
 0x2fa   : >> { %823 = vmax.xlane.f32.xlu1 %v1813_v2 }
 0x2fe   : >> { %825 = vmax.xlane.f32.xlu1 %v1820_v5 }
 0x302   : >> { %829 = vmax.xlane.f32.xlu1 %v1818_v4 }
 0x35e   : >> { %v806_v9 = vpop.xlane.xlu0 %805 }
 0x35f   : >> { %v835_v10 = vsub.f32 %v1395_v56, %v806_v9  ;;  %v802_v11 = vpop.xlane.xlu1 %801 }
 0x360   : >> { %v833_v12 = vsub.f32 %v738_v57, %v802_v11 }
 0x361   : >> { %v853_v13 = vmul.f32 1.442695, %v835_v10 }
 0x362   : >> { %v849_v14 = vmul.f32 1.442695, %v833_v12 }
 0x363   : >> { %1512 = vpow2.f32 %v853_v13  ;;  %v804_v15 = vpop.xlane.xlu1 %803 }
 0x364   : >> { %v834_v16 = vsub.f32 %v741_v59, %v804_v15  ;;  %1514 = vpow2.f32 %v849_v14 }
 0x366   : >> { %v851_v17 = vmul.f32 1.442695, %v834_v16 }
 0x367   : >> { %v808_v18 = vpop.xlane.xlu1 %807 }
 0x368   : >> { %1516 = vpow2.f32 %v851_v17  ;;  %v836_v19 = vsub.f32 %v1396_v58, %v808_v18  ;;  %v663_v17 = vld [vmem:[%s1836_s23 + $0x8] sm:$0xff]  ;;  %s1147_s23 = sshll.u32 (%p639_p11), %s1782_s30, 4  ;;  %s1880_s23 = int_to_ptr.vmem [resolvable:$true] %s1147_s23 }
 0x369   : > { %s1580_s8 = scalar_lea.vmem (%p639_p11), %s1880_s23, 512  ;;  %p1587_p1 = scmp.lt.s32.totalorder (%p639_p11), %s1880_s23, %s1585_s5 }
 0x36a   : >> { %v855_v20 = vmul.f32 1.442695, %v836_v19  ;;  %p1581_p12 = scmp.ne.s32.totalorder (%p639_p11), %s1880_s23, %s1580_s8  ;;  %p1588_p2 = scmp.lt.s32.totalorder (%p639_p11), %s1586_s10, %s1580_s8 }
 0x36b   : >> { %v810_v21 = vpop.xlane.xlu1 %809 }
 0x36c   : >> { %1518 = vpow2.f32 %v855_v20  ;;  %v837_v22 = vsub.f32 %v754_v61, %v810_v21  ;;  %p1582_p13 = pnand (%p639_p11), %p1581_p12, %p1719_p5  ;;  %p1589_p3 = por (%p639_p11), %p1588_p2, %p1587_p1 }
 0x36d   : >> { %v1513_v23 = vpop.eup %1512 }
 0x36e   : >> { %885 = vadd.xlane.f32.xlu1 %v1513_v23  ;;  %v857_v24 = vmul.f32 1.442695, %v837_v22  ;;  %v1515_v27 = vpop.eup %1514  ;;  %p1583_p0 = pneg (%p639_p11), %p1582_p13 }
 0x36f   : >> { %v812_v25 = vpop.xlane.xlu1 %811 }
 0x370   : >> { %v838_v26 = vsub.f32 %v757_v63, %v812_v25  ;;  %1520 = vpow2.f32 %v857_v24  ;;  %p1590_p4 = pnand (%p639_p11), %p1589_p3, %p1583_p0 }
 0x372   : >> { %v1517_v28 = vpop.eup %1516  ;;  %v859_v29 = vmul.f32 1.442695, %v838_v26  ;;  %881 = vadd.xlane.f32.xlu1 %v1515_v27 }
 0x373   : >> { %v814_v30 = vpop.xlane.xlu1 %813  ;;  %883 = vadd.xlane.f32.xlu0 %v1517_v28  ;;  %v913_v31 = vpack.c.bf16 %v1517_v28, %v1515_v27 }
 0x374   : >> { %1522 = vpow2.f32 %v859_v29  ;;  %v839_v32 = vsub.f32 %v1805_v60, %v814_v30 }
 0x375   : >> { %1409 = vmatprep.subr.bf16.mxu1 %v913_v31 }
 0x376   : >> { %v1519_v33 = vpop.eup %1518  ;;  %v861_v34 = vmul.f32 1.442695, %v839_v32  ;;  %1410 = vmatpush3.bf16.xpose.msra.mxu1 %v913_v31 }
 0x377   : >> { %v816_v35 = vpop.xlane.xlu1 %815  ;;  %887 = vadd.xlane.f32.xlu0 %v1519_v33  ;;  %v914_v36 = vpack.c.bf16 %v1519_v33, %v1513_v23 }
 0x378   : >> { %1524 = vpow2.f32 %v861_v34  ;;  %v840_v37 = vsub.f32 %v1807_v62, %v816_v35 }
 0x379   : >> { %1411 = vmatprep.subr.bf16.mxu1 %v914_v36  ;;  %v828_v48 = vpop.xlane.xlu0 %827 }
 0x37a   : >> { %v863_v38 = vmul.f32 1.442695, %v840_v37  ;;  %v1521_v41 = vpop.eup %1520  ;;  %v846_v54 = vsub.f32 %v1825_v7, %v828_v48 }
 0x37b   : >> { %v818_v39 = vpop.xlane.xlu1 %817 }
 0x37c   : >> { %1526 = vpow2.f32 %v863_v38  ;;  %v841_v40 = vsub.f32 %v1811_v1, %v818_v39  ;;  %v875_v60 = vmul.f32 1.442695, %v846_v54 }
 0x37d   : >> { %v832_v57 = vpop.xlane.xlu0 %831 }
 0x37e   : >> { %v1523_v42 = vpop.eup %1522  ;;  %1412 = vmatpush3.bf16.xpose.msra.mxu1 %v914_v36  ;;  %v865_v43 = vmul.f32 1.442695, %v841_v40  ;;  %v848_v61 = vsub.f32 %v1823_v6, %v832_v57 }
 0x37f   : >> { %v820_v44 = vpop.xlane.xlu1 %819  ;;  %891 = vadd.xlane.f32.xlu0 %v1523_v42  ;;  %v915_v45 = vpack.c.bf16 %v1523_v42, %v1521_v41 }
 0x380   : >> { %v842_v46 = vsub.f32 %v1815_v3, %v820_v44  ;;  %1528 = vpow2.f32 %v865_v43  ;;  %v879_v7 = vmul.f32 1.442695, %v848_v61 }
 0x381   : >> { %1413 = vmatprep.subr.bf16.mxu1 %v915_v45 }
 0x382   : >> { %v1525_v47 = vpop.eup %1524  ;;  %v867_v49 = vmul.f32 1.442695, %v842_v46 }
 0x383   : >> { %v822_v50 = vpop.xlane.xlu1 %821  ;;  %893 = vadd.xlane.f32.xlu1 %v1525_v47 }
 0x384   : >> { %1530 = vpow2.f32 %v867_v49  ;;  %v843_v51 = vsub.f32 %v1809_v0, %v822_v50  ;;  %v1018_v50 = vlaneseq }
 0x386   : >> { %v1527_v52 = vpop.eup %1526  ;;  %v869_v53 = vmul.f32 1.442695, %v843_v51  ;;  %1414 = vmatpush3.bf16.xpose.msra.mxu1 %v915_v45 }
 0x387   : >> { %v824_v55 = vpop.xlane.xlu1 %823  ;;  %895 = vadd.xlane.f32.xlu0 %v1527_v52  ;;  %889 = vadd.xlane.f32.xlu1 %v1521_v41  ;;  %v916_v56 = vpack.c.bf16 %v1527_v52, %v1525_v47 }
 0x388   : >> { %1532 = vpow2.f32 %v869_v53  ;;  %v844_v58 = vsub.f32 %v1813_v2, %v824_v55  ;;  %v1019_v53 = vshrl.u32 %v1018_v50, 7 }
 0x389   : >> { %1415 = vmatprep.subr.bf16.mxu1 %v916_v56 }
 0x38a   : >> { %v871_v59 = vmul.f32 1.442695, %v844_v58  ;;  %v1529_v0 = vpop.eup %1528 }
 0x38b   : >> { %v826_v62 = vpop.xlane.xlu1 %825 }
 0x38c   : >> { %1534 = vpow2.f32 %v871_v59  ;;  %v845_v63 = vsub.f32 %v1820_v5, %v826_v62 }
 0x38d   : >> { %1536 = vpow2.f32 %v875_v60 }
 0x38e   : >> { %v1531_v1 = vpop.eup %1530  ;;  %v873_v3 = vmul.f32 1.442695, %v845_v63  ;;  %1416 = vmatpush3.bf16.xpose.msra.mxu1 %v916_v56  ;;  %v1020_v56 = vsub.s32 0, %v1019_v53 }
 0x38f   : >> { %v830_v8 = vpop.xlane.xlu1 %829  ;;  %899 = vadd.xlane.f32.xlu0 %v1531_v1  ;;  %v917_v9 = vpack.c.bf16 %v1531_v1, %v1529_v0 }
 0x390   : >> { %1538 = vpow2.f32 %v873_v3  ;;  %v847_v2 = vsub.f32 %v1818_v4, %v830_v8  ;;  %v1578_v8 = vld [vmem:[%s1930_s2] sm:$0xff] (%p639_p11)  }
 0x391   : >> { %1417 = vmatprep.subr.bf16.mxu1 %v917_v9  ;;  %1540 = vpow2.f32 %v879_v7  ;;  %v1652_v7 = vmov (%p639_p11), 0   ;;  %1445 = vmatprep.mubr.bf16.mxu0 (%p639_p11), %v1578_v8 }
 0x392   : >> { %v1533_v10 = vpop.eup %1532  ;;  %v877_v11 = vmul.f32 1.442695, %v847_v2  ;;  %1576 = vset.pattern.permute.xlu0 (%p639_p11), %v1652_v7  ;;  %v1046_v2 = vld [vmem:[%s1931_s3 + $0x10] sm:$0xff] (%p639_p11) }
 0x393   : >> { %901 = vadd.xlane.f32.xlu1 %v1533_v10 }
 0x394   : >> { %1542 = vpow2.f32 %v877_v11  ;;  %v1047_v11 = vld [vmem:[%s1931_s3 + $0x18] sm:$0xff] (%p639_p11) }
 0x396   : >> { %v1535_v6 = vpop.eup %1534  ;;  %1418 = vmatpush3.bf16.xpose.msra.mxu1 %v917_v9 }
 0x397   : >> { %903 = vadd.xlane.f32.xlu0 %v1535_v6  ;;  %897 = vadd.xlane.f32.xlu1 %v1529_v0  ;;  %v918_v5 = vpack.c.bf16 %v1535_v6, %v1533_v10  ;;  %v1537_v12 = vpop.eup %1536  ;;  %v1044_v10 = vld [vmem:[%s1931_s3] sm:$0xff] (%p639_p11)  ;;  %v1045_v6 = vld [vmem:[%s1931_s3 + $0x8] sm:$0xff] (%p639_p11) }
 0x399   : >> { %1419 = vmatprep.subr.bf16.mxu1 %v918_v5 }
 0x39a   : >> { %v1539_v13 = vpop.eup %1538 }
 0x39b   : >> { %907 = vadd.xlane.f32.xlu0 %v1537_v12  ;;  %v919_v14 = vpack.c.bf16 %v1537_v12, %v1539_v13  ;;  %v1541_v15 = vpop.eup %1540 }
 0x39e   : >> { %v1543_v16 = vpop.eup %1542  ;;  %1420 = vmatpush3.bf16.xpose.msra.mxu1 %v918_v5 }
 0x39f   : >> { %909 = vadd.xlane.f32.xlu1 %v1543_v16  ;;  %1421 = vmatprep.subr.bf16.mxu1 %v919_v14  ;;  %v920_v4 = vpack.c.bf16 %v1541_v15, %v1543_v16  ;;  %v1579_v16 = vld [vmem:[%s1930_s2 + $0x8] sm:$0xff] (%p639_p11)  }
 0x3a0   : >> { %911 = vadd.xlane.f32.xlu0 %v1541_v15 }
 0x3a3   : >> { %905 = vadd.xlane.f32.xlu1 %v1539_v13 }
 0x3a6   : >> { %1422 = vmatpush3.bf16.xpose.msra.mxu1 %v919_v14 }
 0x3a7   : >> { %1423 = vmatprep.subr.bf16.mxu1 %v920_v4 }
 0x3ae   : >> { %1424 = vmatpush3.bf16.xpose.msra.mxu1 %v920_v4 }
 0x3b5   : >> { %1426 = vmatmul.mubr.bf16.vlgmr.msra.gmra.mrb[0].mxu1 %v663_v17 }
 0x3b6   : > { %1050 = vperm.xlu0 (%p639_p11), %1576, %v1044_v10  }
 0x3ba   : > { %1055 = vperm.xlu0 (%p639_p11), %1576, %v1045_v6  }
 0x3fb   : >> { %v886_v18 = vpop.xlane.xlu1 %885 }
 0x3ff   : >> { %v882_v19 = vpop.xlane.xlu1 %881 }
 0x400   : >> { %1544 = vrcp.f32 %v882_v19  ;;  %v884_v20 = vpop.xlane.xlu0 %883 }
 0x401   : >> { %1546 = vrcp.f32 %v884_v20 }
 0x402   : >> { %1548 = vrcp.f32 %v886_v18 }
 0x404   : >> { %v888_v21 = vpop.xlane.xlu0 %887 }
 0x405   : >> { %1550 = vrcp.f32 %v888_v21 }
 0x40a   : >> { %v1545_v22 = vpop.eup %1544 }
 0x40b   : >> { %986 = vxpose.xlu1.b32.start [1/16] (narrow) %v1545_v22, 8  ;;  %v1547_v23 = vpop.eup %1546 }
 0x40c   : >> { %v1549_v25 = vpop.eup %1548  ;;  %v892_v28 = vpop.xlane.xlu0 %891 }
 0x40f   : >> { %987 = vxpose.xlu1.b32.cont [2/16] (narrow) %v1547_v23, 8  ;;  %v1551_v27 = vpop.eup %1550 }
 0x410   : >> { %v894_v24 = vpop.xlane.xlu1 %893 }
 0x413   : >> { %988 = vxpose.xlu1.b32.cont [3/16] (narrow) %v1549_v25, 8 }
 0x414   : >> { %v890_v26 = vpop.xlane.xlu1 %889  ;;  %v896_v29 = vpop.xlane.xlu0 %895 }
 0x415   : >> { %1552 = vrcp.f32 %v890_v26 }
 0x416   : >> { %1554 = vrcp.f32 %v892_v28 }
 0x417   : >> { %989 = vxpose.xlu1.b32.cont [4/16] (narrow) %v1551_v27, 8  ;;  %1556 = vrcp.f32 %v894_v24 }
 0x418   : >> { %1558 = vrcp.f32 %v896_v29 }
 0x41c   : >> { %v900_v34 = vpop.xlane.xlu0 %899 }
 0x41f   : >> { %v1553_v30 = vpop.eup %1552 }
 0x420   : >> { %v902_v31 = vpop.xlane.xlu1 %901  ;;  %990 = vxpose.xlu1.b32.cont [5/16] (narrow) %v1553_v30, 8  ;;  %v1555_v32 = vpop.eup %1554 }
 0x421   : >> { %v1557_v35 = vpop.eup %1556 }
 0x422   : >> { %v1559_v36 = vpop.eup %1558 }
 0x424   : >> { %v898_v33 = vpop.xlane.xlu1 %897  ;;  %991 = vxpose.xlu1.b32.cont [6/16] (narrow) %v1555_v32, 8  ;;  %v904_v38 = vpop.xlane.xlu0 %903 }
 0x425   : >> { %1560 = vrcp.f32 %v898_v33 }
 0x426   : >> { %1562 = vrcp.f32 %v900_v34 }
 0x427   : >> { %1564 = vrcp.f32 %v902_v31 }
 0x428   : >> { %992 = vxpose.xlu1.b32.cont [7/16] (narrow) %v1557_v35, 8  ;;  %1566 = vrcp.f32 %v904_v38  ;;  %v908_v42 = vpop.xlane.xlu0 %907 }
 0x42c   : >> { %v910_v37 = vpop.xlane.xlu1 %909  ;;  %993 = vxpose.xlu1.b32.cont [8/16] (narrow) %v1559_v36, 8 }
 0x42d   : >> { %v912_v45 = vpop.xlane.xlu0 %911 }
 0x42f   : >> { %v1561_v39 = vpop.eup %1560 }
 0x430   : >> { %994 = vxpose.xlu1.b32.cont [9/16] (narrow) %v1561_v39, 8  ;;  %v906_v40 = vpop.xlane.xlu1 %905  ;;  %v1563_v41 = vpop.eup %1562 }
 0x431   : >> { %1568 = vrcp.f32 %v906_v40  ;;  %v1565_v43 = vpop.eup %1564 }
 0x432   : >> { %1570 = vrcp.f32 %v908_v42  ;;  %v1567_v44 = vpop.eup %1566 }
 0x433   : >> { %1572 = vrcp.f32 %v910_v37 }
 0x434   : >> { %995 = vxpose.xlu1.b32.cont [10/16] (narrow) %v1563_v41, 8  ;;  %1574 = vrcp.f32 %v912_v45 }
 0x435   : > { %v1051_v17 = vpop.permute.xlu0 (%p639_p11), %1050 }
 0x438   : >> { %996 = vxpose.xlu1.b32.cont [11/16] (narrow) %v1565_v43, 8 }
 0x439   : > { %v1056_v24 = vpop.permute.xlu0 (%p639_p11), %1055 }
 0x43b   : >> { %v1569_v46 = vpop.eup %1568 }
 0x43c   : >> { %997 = vxpose.xlu1.b32.cont [12/16] (narrow) %v1567_v44, 8  ;;  %v1571_v47 = vpop.eup %1570 }
 0x43d   : >> { %v1573_v48 = vpop.eup %1572 }
 0x43e   : >> { %v1575_v49 = vpop.eup %1574 }
 0x440   : >> { %998 = vxpose.xlu1.b32.cont [13/16] (narrow) %v1569_v46, 8 }
 0x444   : >> { %999 = vxpose.xlu1.b32.cont [14/16] (narrow) %v1571_v47, 8 }
 0x448   : >> { %1000 = vxpose.xlu1.b32.cont [15/16] (narrow) %v1573_v48, 8 }
 0x44c   : >> { %1001 = vxpose.xlu1.b32.end [16/16] (narrow) %v1575_v49, 8 }
 0x46a   : > { %1577 = vset.pattern.permute.xlu1 (%p639_p11), %v1652_v7 }
 0x46b   : > { %1060 = vperm.xlu1 (%p639_p11), %1577, %v1046_v2  }
 0x46f   : > { %1065 = vperm.xlu1 (%p639_p11), %1577, %v1047_v11  }
 0x488   : >> { %v1427_v51 = vpop.f32.mrb[0].mxu1 }
 0x489   : >> { %v955_v52 = vpop.f32.mrb[1].mxu1 }
 0x48a   : >> { %v1428_v54 = vpop.f32.mrb[2].mxu1 }
 0x48b   : >> { %v958_v55 = vpop.f32.mrb[3].mxu1 }
 0x490   : >> { %v1002_v57 = vpop.trf.xlu1 }
 0x491   : >> { %v1021_v58 = vrot.slane %v1002_v57, %v1020_v56  ;;  %641 = sbr.rel (!%p639_p11) target bundleno = 395 (0x18b), region = 82 }
 0x493   : >> { %v1022_v59 = vmul.f32 %v1021_v58, %v955_v52  ;;  %v1023_v60 = vmul.f32 %v1021_v58, %v958_v55  ;;  %v1024_v61 = vmul.f32 %v1427_v51, %v1021_v58  ;;  %v1025_v62 = vmul.f32 %v1428_v54, %v1021_v58 }
 0x495   : >> { %v1026_v63 = vpack.c.bf16 %v1023_v60, %v1022_v59  ;;  %v1027_v0 = vpack.c.bf16 %v1025_v62, %v1024_v61 }
 0x497   : >> { %1030 = vst [vmem:[%s1029_s27] sm:$0xff] %v1026_v63  ;;  %1031 = vst [vmem:[%s1029_s27 + $0x8] sm:$0xff] %v1027_v0 }
 0x49e   : > { %v1036_v1 = vld [vmem:[#allocation3] sm:$0xff]  ;;  %v1037_v3 = vld [vmem:[#allocation3 + $0x8] sm:$0xff]  ;;  %v1038_v9 = vld [vmem:[#allocation3 + $0x10] sm:$0xff] }
 0x49f   : > { %1429 = vmatprep.subr.bf16.mxu0 %v1036_v1  ;;  %v1039_v5 = vld [vmem:[#allocation3 + $0x18] sm:$0xff]  ;;  %v1040_v12 = vld [vmem:[#allocation3 + $0x20] sm:$0xff]  ;;  %v1041_v13 = vld [vmem:[#allocation3 + $0x28] sm:$0xff] }
 0x4a0   : > { %1430 = vmatpush3.bf16.msra.mxu0 %v1036_v1  ;;  %v1042_v14 = vld [vmem:[#allocation3 + $0x30] sm:$0xff]  ;;  %v1043_v15 = vld [vmem:[#allocation3 + $0x38] sm:$0xff] }
 0x4a1   : > { %1431 = vmatprep.subr.bf16.mxu0 %v1037_v3 }
 0x4a4   : > { %1432 = vmatpush3.bf16.msra.mxu0 %v1037_v3 }
 0x4a5   : > { %1433 = vmatprep.subr.bf16.mxu0 %v1038_v9 }
 0x4a8   : > { %1434 = vmatpush3.bf16.msra.mxu0 %v1038_v9 }
 0x4a9   : > { %1435 = vmatprep.subr.bf16.mxu0 %v1039_v5 }
 0x4ac   : > { %1436 = vmatpush3.bf16.msra.mxu0 %v1039_v5 }
 0x4ad   : > { %1437 = vmatprep.subr.bf16.mxu0 %v1040_v12 }
 0x4b0   : > { %1438 = vmatpush3.bf16.msra.mxu0 %v1040_v12 }
 0x4b1   : > { %1439 = vmatprep.subr.bf16.mxu0 %v1041_v13 }
 0x4b4   : > { %1440 = vmatpush3.bf16.msra.mxu0 %v1041_v13 }
 0x4b5   : > { %1441 = vmatprep.subr.bf16.mxu0 %v1042_v14 }
 0x4b8   : > { %1442 = vmatpush3.bf16.msra.mxu0 %v1042_v14 }
 0x4b9   : > { %1443 = vmatprep.subr.bf16.mxu0 %v1043_v15 }
 0x4bc   : > { %1444 = vmatpush3.bf16.msra.mxu0 %v1043_v15 }
 0x4bf   : > { %1446 = vmatmul.mubr.bf16.vlgmr.msra.gmra.mrb[0].mxu0 %v1579_v16 }
 0x4ea   : > { %v1061_v4 = vpop.permute.xlu1 %1060 }
 0x4ee   : > { %v1066_v21 = vpop.permute.xlu1 %1065 }
 0x592   : > { %v1447_v18 = vpop.f32.mrb[0].mxu0 }
 0x593   : > { %v1123_v19 = vadd.f32 %v1447_v18, %v1061_v4  ;;  %v1114_v20 = vpop.f32.mrb[1].mxu0 }
 0x594   : > { %v1115_v22 = vadd.f32 %v1114_v20, %v1051_v17  ;;  %v1448_v23 = vpop.f32.mrb[2].mxu0 }
 0x595   : > { %1131 = vst [vmem:[%s1782_s30 + $0x10] sm:$0xff] %v1123_v19  ;;  %v1126_v25 = vadd.f32 %v1448_v23, %v1066_v21  ;;  %v1117_v26 = vpop.f32.mrb[3].mxu0 }
 0x596   : > { %1129 = vst [vmem:[%s1782_s30] sm:$0xff] %v1115_v22  ;;  %v1118_v27 = vadd.f32 %v1117_v26, %v1056_v24 }
 0x597   : > { %1132 = vst [vmem:[%s1782_s30 + $0x18] sm:$0xff] %v1126_v25 }
 0x598   : > { %1130 = vst [vmem:[%s1782_s30 + $0x8] sm:$0xff] %v1118_v27 }
 0x599   : > { %1593 = shalt.err (!%p1590_p4)
}
 0x59a   : > { %s1594_s29 = scalar_lea.hbm %s1878_s7, 512  ;;  %s1598_s6 = scalar_lea.hbm %s1932_s4, 1024 }
 0x59b   : > { %p1595_p7 = scmp.ne.s32.totalorder %s1878_s7, %s1594_s29  ;;  %p1599_p10 = scmp.lt.u32.totalorder %s1878_s7, %s1932_s4 }
 0x59c   : > { %p1600_p11 = scmp.lt.u32.totalorder %s1598_s6, %s1594_s29  ;;  %p1602_p13 = scmp.lt.u32.totalorder %s1594_s29, %s1878_s7 }
 0x59d   : > { %p1596_p8 = pnand %p1595_p7, %p1719_p5 }
 0x59e   : > { %p1601_p12 = por %p1600_p11, %p1599_p10 }
 0x59f   : > { %p1597_p9 = pneg %p1596_p8 }
 0x5a0   : > { %p1603_p0 = por %p1602_p13, %p1601_p12 }
 0x5a2   : > { %p1604_p1 = pnand %p1603_p0, %p1597_p9 }
 0x5a4   : > { %1607 = shalt.err (!%p1604_p1)
}
 0x5a5   : > { %s1654_s14 = smov 128   ;;  %s1655_s20 = smov 8  }
 0x5a6   : > { %1453 = dma.vmem_to_hbm [thread:$0]  (%p1719_p5), %s1880_s23, 512, %s1878_s7, %s1887_s19, %s1654_s14, %s1654_s14, %s1655_s20  }
 0x5a7 PF: > { %p1459_p2 = scmp.ge.s32.totalorder %s1646_s18, 2  ;;  %s1162_s22 = sand.u32 1, %s1634_s15  }
 0x5a8   : > { %s1163_s27 = scalar_lea.sflag [#allocation5], %s1162_s22 }
 0x5a9   : > { %p1456_p3 = pnand %p1459_p2, %p1723_p6 }
 0x5ab   : > { %1629 = dma.done.wait (!%p1456_p3), %s1163_s27, 512  }
 0x5ac   : > { %1631 = vsyncadd (!%p1456_p3), %s1163_s27, 4294966784  ;;  %p14_p4 = scmp.ge.s32.totalorder %s1706_s21, 4   ;;  %s1935_s15 = smov %s1638_s16 }
 0x5ad   : > { %s1936_s16 = smov %s1642_s17  ;;  %s1937_s17 = smov %s1717_s24 }
 0x5ae   : > { %s1938_s18 = smov %s1706_s21  ;;  %16 = sbr.rel (!%p14_p4) target bundleno = 3 (0x3), region = 93 }
 0x5b5   :  { %1168 = vsyncpa [#allocation5], 1 }
 0x5b6   :  { %1170 = vsyncpa [#allocation5 + $0x1], 1 }

</bundles_post_ra>
